<compile_context>
chip_gen: v5e
topology: v5e:2x2
jax: 0.10.0
libtpu: 0.0.40
codegen_flags: <defaults>
</compile_context>

<pallas_src>
import jax
import jax.numpy as jnp
from jax.experimental import pallas as pl
from jax.experimental.pallas import tpu as pltpu


def _make_ode_mlp_kernel(compute_dtype):
    """Fused 8-layer MLP kernel. Matmuls accumulate in f32; operands in compute_dtype."""
    cd = jnp.dtype(compute_dtype)
    f32 = jnp.float32

    def kernel(x0_ref, c_ref,
               w0_ref, wc_ref, wbody_ref, w7_ref,
               bbody_ref, b7_ref,
               out_ref):
        H = wbody_ref.shape[1]
        x0 = x0_ref[...]          # [Bt, L+V+1] = cat([latent, ved, t])  (compute_dtype)
        c = c_ref[...]            # [Bt, V+1]   = cat([ved, t])          (compute_dtype)

        def dot(a, b):
            return jnp.dot(a, b, preferred_element_type=f32)

        def layer(h, w, b):
            return jnp.maximum(dot(h, w) + b, 0.0).astype(cd)

        # Fused skip projection: cat([ved, t]) hits both skip-layer concat
        # weight blocks in one K=(V+1), N=2H matmul.  The slices below sit on
        # lane boundaries when H is a multiple of 128 (free layout plumbing).
        cproj = dot(c, wc_ref[...])                                   # [Bt, 2H] f32

        h = layer(x0, w0_ref[...], bbody_ref[0:1, :])                 # L+V+1 -> H
        h = layer(h, wbody_ref[0], bbody_ref[1:2, :])                 # H -> H
        # skip layer: cat([h, ved, t]) @ W2 == h @ W2h + c @ W2c
        h = jnp.maximum(dot(h, wbody_ref[1]) + cproj[:, :H]
                        + bbody_ref[2:3, :], 0.0).astype(cd)
        h = layer(h, wbody_ref[2], bbody_ref[3:4, :])                 # H -> H
        h = layer(h, wbody_ref[3], bbody_ref[4:5, :])                 # H -> H
        # skip layer: cat([h, ved, t]) @ W5 == h @ W5h + c @ W5c
        h = jnp.maximum(dot(h, wbody_ref[4]) + cproj[:, H:]
                        + bbody_ref[5:6, :], 0.0).astype(cd)
        h = layer(h, wbody_ref[5], bbody_ref[6:7, :])                 # H -> H
        # final: lane-padded Linear(H -> OUT_PAD) + tanh (padded cols are 0).
        out_ref[...] = jnp.tanh(dot(h, w7_ref[...]) + b7_ref[...]).astype(out_ref.dtype)

    return kernel


def _linear_init(key, fan_in, fan_out):
    """PyTorch nn.Linear default init: U(-1/sqrt(fan_in), +1/sqrt(fan_in))."""
    kw, kb = jax.random.split(key)
    bound = 1.0 / float(fan_in) ** 0.5
    w = jax.random.uniform(kw, (fan_in, fan_out), jnp.float32, -bound, bound)
    b = jax.random.uniform(kb, (1, fan_out), jnp.float32, -bound, bound)
    return w, b


def init_params(key, latent_dim, voxel_dim, hidden_dim):
    keys = jax.random.split(key, 8)
    p = {}
    p["w0"], p["b0"] = _linear_init(keys[0], latent_dim + voxel_dim + 1, hidden_dim)
    p["w1"], p["b1"] = _linear_init(keys[1], hidden_dim, hidden_dim)
    w2, p["b2"] = _linear_init(keys[2], hidden_dim + voxel_dim + 1, hidden_dim)
    p["w2h"], p["w2c"] = w2[:hidden_dim], w2[hidden_dim:]
    p["w3"], p["b3"] = _linear_init(keys[3], hidden_dim, hidden_dim)
    p["w4"], p["b4"] = _linear_init(keys[4], hidden_dim, hidden_dim)
    w5, p["b5"] = _linear_init(keys[5], hidden_dim + voxel_dim + 1, hidden_dim)
    p["w5h"], p["w5c"] = w5[:hidden_dim], w5[hidden_dim:]
    p["w6"], p["b6"] = _linear_init(keys[6], hidden_dim, hidden_dim)
    p["w7"], p["b7"] = _linear_init(keys[7], hidden_dim, latent_dim)
    return p


def prepare_params(params, *, compute_dtype=jnp.bfloat16):
    """One-time weight prep (cast / pad / pack) hoisted out of the solver loop."""
    cd = jnp.dtype(compute_dtype)
    H = params["w1"].shape[0]
    L = params["w7"].shape[1]
    out_pad = max(128, ((L + 127) // 128) * 128)
    return {
        "compute_dtype": cd,
        "latent_dim": L,
        "hidden_dim": H,
        "out_pad": out_pad,
        # first layer (L+V+1 -> H)
        "w0": params["w0"].astype(cd),
        # fused skip-concat weights: cat([ved,t]) @ [w2c | w5c]  -> [Bt, 2H]
        "wc": jnp.concatenate([params["w2c"], params["w5c"]], axis=1).astype(cd),
        # six HxH body weights packed into one array (one DMA descriptor)
        "wbody": jnp.stack([params["w1"], params["w2h"], params["w3"],
                            params["w4"], params["w5h"], params["w6"]], axis=0).astype(cd),
        # final layer lane-padded to out_pad columns
        "w7": jnp.pad(params["w7"], ((0, 0), (0, out_pad - L))).astype(cd),
        # biases stay f32 (added to f32 accumulator); packed into one array
        "bbody": jnp.concatenate([params[f"b{i}"] for i in range(7)], axis=0).astype(jnp.float32),
        "b7": jnp.pad(params["b7"], ((0, 0), (0, out_pad - L))).astype(jnp.float32),
    }


def _pick_batch_tile(B):
    # Small batches: one full-extent block (no per-step overhead; the 1-D grid
    # is a serial loop on single-TC v5e/v6e).
    if B <= 512:
        return B
    # Larger batches: aim for >=4 grid steps so each v7x TensorCore gets >=2
    # steps (restores per-core DMA/compute double-buffering), preferring the
    # largest such MXU-filling tile.
    for cand in (512, 256, 128):
        if pl.cdiv(B, cand) >= 4:
            return cand
    return 128


def ode_network_forward(prep, voxel_embedding, t, latent, *, batch_tile=None):
    cd = prep["compute_dtype"]
    B, L = latent.shape
    assert L == prep["latent_dim"]
    H = prep["hidden_dim"]
    out_pad = prep["out_pad"]

    # Glue: build the concatenated inputs once (feature axis last).
    x0 = jnp.concatenate([latent, voxel_embedding, t[:, None]], axis=1).astype(cd)
    c = jnp.concatenate([voxel_embedding, t[:, None]], axis=1).astype(cd)

    if batch_tile is None:
        batch_tile = _pick_batch_tile(B)
    # Pad the batch up to a tile multiple (zeros flow through the net harmlessly
    # and are sliced off below) instead of falling back to one huge block.
    Bp = pl.cdiv(B, batch_tile) * batch_tile
    if Bp != B:
        x0 = jnp.pad(x0, ((0, Bp - B), (0, 0)))
        c = jnp.pad(c, ((0, Bp - B), (0, 0)))

    in0 = x0.shape[1]
    cw = c.shape[1]

    args = (x0, c,
            prep["w0"], prep["wc"], prep["wbody"], prep["w7"],
            prep["bbody"], prep["b7"])

    def row_spec(feat):
        # Tiled over batch, full feature extent.
        return pl.BlockSpec((batch_tile, feat), lambda i: (i, 0))

    def whole(a):
        # Whole array resident in VMEM; constant block index -> the pipeline
        # does not re-DMA it across grid steps.
        nd = a.ndim
        return pl.BlockSpec(a.shape, lambda i: (0,) * nd)

    in_specs = [row_spec(in0), row_spec(cw)] + [whole(a) for a in args[2:]]
    out_specs = row_spec(out_pad)

    # Right-sized VMEM budget: double-buffered activation tiles + (conservatively
    # double-buffered) packed weights, with headroom for Mosaic scratch.
    itemsize = cd.itemsize
    tile_bytes = 2 * batch_tile * (in0 + cw + out_pad) * itemsize
    weight_bytes = sum(int(a.size) * a.dtype.itemsize for a in args[2:])
    vmem_limit = int(min(max(2 * (tile_bytes + weight_bytes) + (2 << 20), 8 << 20),
                         32 << 20))

    # Advisory cost model (this network runs every ODE-solver step): count the
    # real MXU flops, the tanh transcendentals and ALL HBM traffic.
    flops = 2 * Bp * (in0 * H + 6 * H * H + cw * 2 * H + H * out_pad)
    bytes_accessed = (weight_bytes
                      + Bp * (in0 + cw) * itemsize          # activation inputs
                      + Bp * out_pad * itemsize)            # output (compute dtype)
    cost = pl.CostEstimate(flops=int(flops),
                           transcendentals=int(Bp * out_pad),
                           bytes_accessed=int(bytes_accessed))

    out = pl.pallas_call(
        _make_ode_mlp_kernel(cd),
        out_shape=jax.ShapeDtypeStruct((Bp, out_pad), cd),
        grid=(Bp // batch_tile,),
        in_specs=in_specs,
        out_specs=out_specs,
        compiler_params=pltpu.CompilerParams(
            dimension_semantics=("parallel",),
            vmem_limit_bytes=vmem_limit),
        cost_estimate=cost,
    )(*args)

    return out[:B, :L].astype(latent.dtype)


def ref_forward(params, voxel_embedding, t, latent):
    """Pure-JAX (f32) reference of the same network."""
    x = jnp.concatenate([latent, voxel_embedding, t[:, None]], axis=1)
    c = jnp.concatenate([voxel_embedding, t[:, None]], axis=1)
    h = jax.nn.relu(x @ params["w0"] + params["b0"])
    h = jax.nn.relu(h @ params["w1"] + params["b1"])
    h = jax.nn.relu(h @ params["w2h"] + c @ params["w2c"] + params["b2"])
    h = jax.nn.relu(h @ params["w3"] + params["b3"])
    h = jax.nn.relu(h @ params["w4"] + params["b4"])
    h = jax.nn.relu(h @ params["w5h"] + c @ params["w5c"] + params["b5"])
    h = jax.nn.relu(h @ params["w6"] + params["b6"])
    return jnp.tanh(h @ params["w7"] + params["b7"])


if __name__ == "__main__":
    LATENT_DIM, VOXEL_DIM, HIDDEN_DIM = 8, 16, 128

    key = jax.random.PRNGKey(0)
    k_params = jax.random.fold_in(key, 0)
    params = init_params(k_params, LATENT_DIM, VOXEL_DIM, HIDDEN_DIM)

    def make_inputs(batch):
        kv, kt, kl = jax.random.split(jax.random.fold_in(key, batch), 3)
        ved = jax.random.normal(kv, (batch, VOXEL_DIM), jnp.float32)
        tt = jax.random.uniform(kt, (batch,), jnp.float32)
        lat = jax.random.normal(kl, (batch, LATENT_DIM), jnp.float32)
        return ved, tt, lat

    # 1) toy batch, f32 compute path: single full-extent block (no grid-step
    #    overhead), tight numeric check against the pure-JAX reference.
    prep_f32 = prepare_params(params, compute_dtype=jnp.float32)
    ved, t, lat = make_inputs(16)
    out = jax.block_until_ready(ode_network_forward(prep_f32, ved, t, lat))
    ref = ref_forward(params, ved, t, lat)
    assert out.shape == (16, LATENT_DIM)
    assert jnp.allclose(out, ref, atol=1e-5, rtol=1e-5), "f32 mismatch vs reference"

    # 2) realistic non-multiple batch, default bf16 compute (MXU fast path on
    #    v5e/v6e/v7x): tile=256 -> 4 "parallel" grid steps (>=2 per v7x core),
    #    batch padded 1000 -> 1024 inside the wrapper, accumulation in f32.
    prep_bf16 = prepare_params(params)   # bf16 default
    ved, t, lat = make_inputs(1000)
    out = jax.block_until_ready(ode_network_forward(prep_bf16, ved, t, lat))
    ref = ref_forward(params, ved, t, lat)
    assert out.shape == (1000, LATENT_DIM)
    assert jnp.allclose(out, ref, atol=5e-2, rtol=5e-2), "bf16 mismatch vs reference"

    print("KERNEL_OK")
</pallas_src>

<mosaic_0001>
module attributes {stable_mosaic.version = 11 : i64} {
  func.func @kernel(%arg0: i32, %arg1: memref<16x25xf32, #tpu.memory_space<vmem>>, %arg2: memref<16x17xf32, #tpu.memory_space<vmem>>, %arg3: memref<25x128xf32, #tpu.memory_space<vmem>>, %arg4: memref<17x256xf32, #tpu.memory_space<vmem>>, %arg5: memref<6x128x128xf32, #tpu.memory_space<vmem>>, %arg6: memref<128x128xf32, #tpu.memory_space<vmem>>, %arg7: memref<7x128xf32, #tpu.memory_space<vmem>>, %arg8: memref<1x128xf32, #tpu.memory_space<vmem>>, %arg9: memref<16x128xf32, #tpu.memory_space<vmem>>) attributes {dimension_semantics = [#tpu.dimension_semantics<parallel>], iteration_bounds = array<i64: 1>, scalar_prefetch = 0 : i64, scratch_operands = 0 : i64, tpu.core_type = #tpu.core_type<tc>, window_params = [{transform_indices = @transform_0, window_bounds = array<i64: 16, 25>}, {transform_indices = @transform_1, window_bounds = array<i64: 16, 17>}, {pipeline_mode = #tpu.pipeline_mode<synchronous>, transform_indices = @transform_2, window_bounds = array<i64: 25, 128>}, {pipeline_mode = #tpu.pipeline_mode<synchronous>, transform_indices = @transform_3, window_bounds = array<i64: 17, 256>}, {pipeline_mode = #tpu.pipeline_mode<synchronous>, transform_indices = @transform_4, window_bounds = array<i64: 6, 128, 128>}, {pipeline_mode = #tpu.pipeline_mode<synchronous>, transform_indices = @transform_5, window_bounds = array<i64: 128, 128>}, {pipeline_mode = #tpu.pipeline_mode<synchronous>, transform_indices = @transform_6, window_bounds = array<i64: 7, 128>}, {pipeline_mode = #tpu.pipeline_mode<synchronous>, transform_indices = @transform_7, window_bounds = array<i64: 1, 128>}, {transform_indices = @transform_8, window_bounds = array<i64: 16, 128>}]} {
    %c0 = arith.constant 0 : index
    %c0_0 = arith.constant 0 : index
    %0 = vector.load %arg1[%c0, %c0_0] : memref<16x25xf32, #tpu.memory_space<vmem>>, vector<16x25xf32>
    %c0_1 = arith.constant 0 : index
    %c0_2 = arith.constant 0 : index
    %1 = vector.load %arg2[%c0_1, %c0_2] : memref<16x17xf32, #tpu.memory_space<vmem>>, vector<16x17xf32>
    %c0_3 = arith.constant 0 : index
    %c0_4 = arith.constant 0 : index
    %2 = vector.load %arg4[%c0_3, %c0_4] : memref<17x256xf32, #tpu.memory_space<vmem>>, vector<17x256xf32>
    %cst = arith.constant dense<0.000000e+00> : vector<16x256xf32>
    %3 = tpu.matmul %1, %2, %cst {dimension_numbers = #tpu.dot_dimension_numbers<[1], [0], [0], [1], [0, 0, 1, 1], [], []>} : vector<16x17xf32>, vector<17x256xf32>, vector<16x256xf32> -> vector<16x256xf32>
    %c0_5 = arith.constant 0 : index
    %c0_6 = arith.constant 0 : index
    %4 = vector.load %arg3[%c0_5, %c0_6] : memref<25x128xf32, #tpu.memory_space<vmem>>, vector<25x128xf32>
    %c0_7 = arith.constant 0 : index
    %c0_8 = arith.constant 0 : index
    %5 = vector.load %arg7[%c0_7, %c0_8] : memref<7x128xf32, #tpu.memory_space<vmem>>, vector<1x128xf32>
    %cst_9 = arith.constant dense<0.000000e+00> : vector<16x128xf32>
    %6 = tpu.matmul %0, %4, %cst_9 {dimension_numbers = #tpu.dot_dimension_numbers<[1], [0], [0], [1], [0, 0, 1, 1], [], []>} : vector<16x25xf32>, vector<25x128xf32>, vector<16x128xf32> -> vector<16x128xf32>
    %7 = vector.broadcast %5 : vector<1x128xf32> to vector<16x128xf32>
    %8 = arith.addf %6, %7 : vector<16x128xf32>
    %cst_10 = arith.constant 0.000000e+00 : f32
    %9 = vector.broadcast %cst_10 : f32 to vector<16x128xf32>
    %10 = arith.maximumf %8, %9 : vector<16x128xf32>
    %c0_11 = arith.constant 0 : index
    %c0_12 = arith.constant 0 : index
    %c0_13 = arith.constant 0 : index
    %11 = vector.load %arg5[%c0_11, %c0_12, %c0_13] : memref<6x128x128xf32, #tpu.memory_space<vmem>>, vector<1x128x128xf32>
    %12 = vector.shape_cast %11 : vector<1x128x128xf32> to vector<128x128xf32>
    %c1 = arith.constant 1 : index
    %c0_14 = arith.constant 0 : index
    %13 = vector.load %arg7[%c1, %c0_14] : memref<7x128xf32, #tpu.memory_space<vmem>>, vector<1x128xf32>
    %cst_15 = arith.constant dense<0.000000e+00> : vector<16x128xf32>
    %14 = tpu.matmul %10, %12, %cst_15 {dimension_numbers = #tpu.dot_dimension_numbers<[1], [0], [0], [1], [0, 0, 1, 1], [], []>} : vector<16x128xf32>, vector<128x128xf32>, vector<16x128xf32> -> vector<16x128xf32>
    %15 = vector.broadcast %13 : vector<1x128xf32> to vector<16x128xf32>
    %16 = arith.addf %14, %15 : vector<16x128xf32>
    %cst_16 = arith.constant 0.000000e+00 : f32
    %17 = vector.broadcast %cst_16 : f32 to vector<16x128xf32>
    %18 = arith.maximumf %16, %17 : vector<16x128xf32>
    %c1_17 = arith.constant 1 : index
    %c0_18 = arith.constant 0 : index
    %c0_19 = arith.constant 0 : index
    %19 = vector.load %arg5[%c1_17, %c0_18, %c0_19] : memref<6x128x128xf32, #tpu.memory_space<vmem>>, vector<1x128x128xf32>
    %20 = vector.shape_cast %19 : vector<1x128x128xf32> to vector<128x128xf32>
    %cst_20 = arith.constant dense<0.000000e+00> : vector<16x128xf32>
    %21 = tpu.matmul %18, %20, %cst_20 {dimension_numbers = #tpu.dot_dimension_numbers<[1], [0], [0], [1], [0, 0, 1, 1], [], []>} : vector<16x128xf32>, vector<128x128xf32>, vector<16x128xf32> -> vector<16x128xf32>
    %22 = vector.extract_strided_slice %3 {offsets = [0, 0], sizes = [16, 128], strides = [1, 1]} : vector<16x256xf32> to vector<16x128xf32>
    %23 = arith.addf %21, %22 : vector<16x128xf32>
    %c2 = arith.constant 2 : index
    %c0_21 = arith.constant 0 : index
    %24 = vector.load %arg7[%c2, %c0_21] : memref<7x128xf32, #tpu.memory_space<vmem>>, vector<1x128xf32>
    %25 = vector.broadcast %24 : vector<1x128xf32> to vector<16x128xf32>
    %26 = arith.addf %23, %25 : vector<16x128xf32>
    %cst_22 = arith.constant 0.000000e+00 : f32
    %27 = vector.broadcast %cst_22 : f32 to vector<16x128xf32>
    %28 = arith.maximumf %26, %27 : vector<16x128xf32>
    %c2_23 = arith.constant 2 : index
    %c0_24 = arith.constant 0 : index
    %c0_25 = arith.constant 0 : index
    %29 = vector.load %arg5[%c2_23, %c0_24, %c0_25] : memref<6x128x128xf32, #tpu.memory_space<vmem>>, vector<1x128x128xf32>
    %30 = vector.shape_cast %29 : vector<1x128x128xf32> to vector<128x128xf32>
    %c3 = arith.constant 3 : index
    %c0_26 = arith.constant 0 : index
    %31 = vector.load %arg7[%c3, %c0_26] : memref<7x128xf32, #tpu.memory_space<vmem>>, vector<1x128xf32>
    %cst_27 = arith.constant dense<0.000000e+00> : vector<16x128xf32>
    %32 = tpu.matmul %28, %30, %cst_27 {dimension_numbers = #tpu.dot_dimension_numbers<[1], [0], [0], [1], [0, 0, 1, 1], [], []>} : vector<16x128xf32>, vector<128x128xf32>, vector<16x128xf32> -> vector<16x128xf32>
    %33 = vector.broadcast %31 : vector<1x128xf32> to vector<16x128xf32>
    %34 = arith.addf %32, %33 : vector<16x128xf32>
    %cst_28 = arith.constant 0.000000e+00 : f32
    %35 = vector.broadcast %cst_28 : f32 to vector<16x128xf32>
    %36 = arith.maximumf %34, %35 : vector<16x128xf32>
    %c3_29 = arith.constant 3 : index
    %c0_30 = arith.constant 0 : index
    %c0_31 = arith.constant 0 : index
    %37 = vector.load %arg5[%c3_29, %c0_30, %c0_31] : memref<6x128x128xf32, #tpu.memory_space<vmem>>, vector<1x128x128xf32>
    %38 = vector.shape_cast %37 : vector<1x128x128xf32> to vector<128x128xf32>
    %c4 = arith.constant 4 : index
    %c0_32 = arith.constant 0 : index
    %39 = vector.load %arg7[%c4, %c0_32] : memref<7x128xf32, #tpu.memory_space<vmem>>, vector<1x128xf32>
    %cst_33 = arith.constant dense<0.000000e+00> : vector<16x128xf32>
    %40 = tpu.matmul %36, %38, %cst_33 {dimension_numbers = #tpu.dot_dimension_numbers<[1], [0], [0], [1], [0, 0, 1, 1], [], []>} : vector<16x128xf32>, vector<128x128xf32>, vector<16x128xf32> -> vector<16x128xf32>
    %41 = vector.broadcast %39 : vector<1x128xf32> to vector<16x128xf32>
    %42 = arith.addf %40, %41 : vector<16x128xf32>
    %cst_34 = arith.constant 0.000000e+00 : f32
    %43 = vector.broadcast %cst_34 : f32 to vector<16x128xf32>
    %44 = arith.maximumf %42, %43 : vector<16x128xf32>
    %c4_35 = arith.constant 4 : index
    %c0_36 = arith.constant 0 : index
    %c0_37 = arith.constant 0 : index
    %45 = vector.load %arg5[%c4_35, %c0_36, %c0_37] : memref<6x128x128xf32, #tpu.memory_space<vmem>>, vector<1x128x128xf32>
    %46 = vector.shape_cast %45 : vector<1x128x128xf32> to vector<128x128xf32>
    %cst_38 = arith.constant dense<0.000000e+00> : vector<16x128xf32>
    %47 = tpu.matmul %44, %46, %cst_38 {dimension_numbers = #tpu.dot_dimension_numbers<[1], [0], [0], [1], [0, 0, 1, 1], [], []>} : vector<16x128xf32>, vector<128x128xf32>, vector<16x128xf32> -> vector<16x128xf32>
    %48 = vector.extract_strided_slice %3 {offsets = [0, 128], sizes = [16, 128], strides = [1, 1]} : vector<16x256xf32> to vector<16x128xf32>
    %49 = arith.addf %47, %48 : vector<16x128xf32>
    %c5 = arith.constant 5 : index
    %c0_39 = arith.constant 0 : index
    %50 = vector.load %arg7[%c5, %c0_39] : memref<7x128xf32, #tpu.memory_space<vmem>>, vector<1x128xf32>
    %51 = vector.broadcast %50 : vector<1x128xf32> to vector<16x128xf32>
    %52 = arith.addf %49, %51 : vector<16x128xf32>
    %cst_40 = arith.constant 0.000000e+00 : f32
    %53 = vector.broadcast %cst_40 : f32 to vector<16x128xf32>
    %54 = arith.maximumf %52, %53 : vector<16x128xf32>
    %c5_41 = arith.constant 5 : index
    %c0_42 = arith.constant 0 : index
    %c0_43 = arith.constant 0 : index
    %55 = vector.load %arg5[%c5_41, %c0_42, %c0_43] : memref<6x128x128xf32, #tpu.memory_space<vmem>>, vector<1x128x128xf32>
    %56 = vector.shape_cast %55 : vector<1x128x128xf32> to vector<128x128xf32>
    %c6 = arith.constant 6 : index
    %c0_44 = arith.constant 0 : index
    %57 = vector.load %arg7[%c6, %c0_44] : memref<7x128xf32, #tpu.memory_space<vmem>>, vector<1x128xf32>
    %cst_45 = arith.constant dense<0.000000e+00> : vector<16x128xf32>
    %58 = tpu.matmul %54, %56, %cst_45 {dimension_numbers = #tpu.dot_dimension_numbers<[1], [0], [0], [1], [0, 0, 1, 1], [], []>} : vector<16x128xf32>, vector<128x128xf32>, vector<16x128xf32> -> vector<16x128xf32>
    %59 = vector.broadcast %57 : vector<1x128xf32> to vector<16x128xf32>
    %60 = arith.addf %58, %59 : vector<16x128xf32>
    %cst_46 = arith.constant 0.000000e+00 : f32
    %61 = vector.broadcast %cst_46 : f32 to vector<16x128xf32>
    %62 = arith.maximumf %60, %61 : vector<16x128xf32>
    %c0_47 = arith.constant 0 : index
    %c0_48 = arith.constant 0 : index
    %63 = vector.load %arg6[%c0_47, %c0_48] : memref<128x128xf32, #tpu.memory_space<vmem>>, vector<128x128xf32>
    %cst_49 = arith.constant dense<0.000000e+00> : vector<16x128xf32>
    %64 = tpu.matmul %62, %63, %cst_49 {dimension_numbers = #tpu.dot_dimension_numbers<[1], [0], [0], [1], [0, 0, 1, 1], [], []>} : vector<16x128xf32>, vector<128x128xf32>, vector<16x128xf32> -> vector<16x128xf32>
    %c0_50 = arith.constant 0 : index
    %c0_51 = arith.constant 0 : index
    %65 = vector.load %arg8[%c0_50, %c0_51] : memref<1x128xf32, #tpu.memory_space<vmem>>, vector<1x128xf32>
    %66 = vector.broadcast %65 : vector<1x128xf32> to vector<16x128xf32>
    %67 = arith.addf %64, %66 : vector<16x128xf32>
    %68 = math.tanh %67 : vector<16x128xf32>
    %c0_52 = arith.constant 0 : index
    %c0_53 = arith.constant 0 : index
    %69 = vector.load %arg9[%c0_52, %c0_53] : memref<16x128xf32, #tpu.memory_space<vmem>>, vector<16x128xf32>
    tpu.vector_store %arg9[%c0_52, %c0_53], %68 {strides = array<i32>} : memref<16x128xf32, #tpu.memory_space<vmem>>, vector<16x128xf32>,
    return
  }
  func.func @transform_0(%arg0: i32) -> (i32, i32) {
    %c0_i32 = arith.constant 0 : i32
    %c0_i32_0 = arith.constant 0 : i32
    return %arg0, %c0_i32 : i32, i32
  }
  func.func @transform_1(%arg0: i32) -> (i32, i32) {
    %c0_i32 = arith.constant 0 : i32
    %c0_i32_0 = arith.constant 0 : i32
    return %arg0, %c0_i32 : i32, i32
  }
  func.func @transform_2(%arg0: i32) -> (i32, i32) {
    %c0_i32 = arith.constant 0 : i32
    %c0_i32_0 = arith.constant 0 : i32
    %c0_i32_1 = arith.constant 0 : i32
    return %c0_i32, %c0_i32_0 : i32, i32
  }
  func.func @transform_3(%arg0: i32) -> (i32, i32) {
    %c0_i32 = arith.constant 0 : i32
    %c0_i32_0 = arith.constant 0 : i32
    %c0_i32_1 = arith.constant 0 : i32
    return %c0_i32, %c0_i32_0 : i32, i32
  }
  func.func @transform_4(%arg0: i32) -> (i32, i32, i32) {
    %c0_i32 = arith.constant 0 : i32
    %c0_i32_0 = arith.constant 0 : i32
    %c0_i32_1 = arith.constant 0 : i32
    %c0_i32_2 = arith.constant 0 : i32
    return %c0_i32, %c0_i32_0, %c0_i32_1 : i32, i32, i32
  }
  func.func @transform_5(%arg0: i32) -> (i32, i32) {
    %c0_i32 = arith.constant 0 : i32
    %c0_i32_0 = arith.constant 0 : i32
    %c0_i32_1 = arith.constant 0 : i32
    return %c0_i32, %c0_i32_0 : i32, i32
  }
  func.func @transform_6(%arg0: i32) -> (i32, i32) {
    %c0_i32 = arith.constant 0 : i32
    %c0_i32_0 = arith.constant 0 : i32
    %c0_i32_1 = arith.constant 0 : i32
    return %c0_i32, %c0_i32_0 : i32, i32
  }
  func.func @transform_7(%arg0: i32) -> (i32, i32) {
    %c0_i32 = arith.constant 0 : i32
    %c0_i32_0 = arith.constant 0 : i32
    %c0_i32_1 = arith.constant 0 : i32
    return %c0_i32, %c0_i32_0 : i32, i32
  }
  func.func @transform_8(%arg0: i32) -> (i32, i32) {
    %c0_i32 = arith.constant 0 : i32
    %c0_i32_0 = arith.constant 0 : i32
    return %arg0, %c0_i32 : i32, i32
  }
}

</mosaic_0001>

<bundles_post_ra>
// kernel: tpu_custom_call.1
= control target key start
LH: loop header
LB: loop body
LE: loop exit
PB: predicated region body
PF: predicated region fallthrough
CT: control target
= control target key end

     0   :  { %13 = vsyncpa [#allocation3], 0  ;;  %s948_s0 = inlined_call_operand.hbm [shape: f32[16,25], index: 0, kind: input, shape index: {}]   ;;  %s949_s1 = inlined_call_operand.hbm [shape: f32[16,17], index: 1, kind: input, shape index: {}]   ;;  %s950_s2 = inlined_call_operand.hbm [shape: f32[25,128], index: 2, kind: input, shape index: {}]   ;;  %s951_s3 = inlined_call_operand.hbm [shape: f32[17,256], index: 3, kind: input, shape index: {}]   ;;  %s952_s4 = inlined_call_operand.hbm [shape: f32[6,128,128], index: 4, kind: input, shape index: {}]   ;;  %s953_s5 = inlined_call_operand.hbm [shape: f32[128,128], index: 5, kind: input, shape index: {}]   ;;  %s954_s6 = inlined_call_operand.hbm [shape: f32[7,128], index: 6, kind: input, shape index: {}]   ;;  %s955_s7 = inlined_call_operand.vmem [shape: f32[1,128], index: 7, kind: input, shape index: {}]   ;;  %s956_s8 = inlined_call_operand.hbm [shape: f32[16,128], index: 8, kind: output, shape index: {}]  }
   0x1   :  { %14 = vsyncpa [#allocation6], 0 }
   0x2   :  { %15 = vsyncpa [#allocation9], 0 }
   0x3   :  { %16 = vsyncpa [#allocation12], 0 }
   0x4   :  { %17 = vsyncpa [#allocation4], 0  ;;  %s35_s29 = sshll.u32 %s949_s1, 4  ;;  %s819_s30 = smov [#allocation5]   ;;  %s36_s29 = int_to_ptr.hbm [resolvable:$true] %s35_s29 }
   0x5   :  { %s37_s9 = sshll.u32 %s819_s30, 4  ;;  %s61_s12 = sshll.u32 %s951_s3, 4  ;;  %s38_s9 = int_to_ptr.vmem [resolvable:$true] %s37_s9  ;;  %s62_s12 = int_to_ptr.hbm [resolvable:$true] %s61_s12 }
   0x6   :  { %s820_s13 = smov 128   ;;  %s821_s14 = smov 8  }
   0x7   :  { %43 = dma.hbm_to_vmem [thread:$0]  %s36_s29, 256, %s38_s9, [#allocation6], %s820_s13, %s820_s13, %s821_s14  }
   0x8   :  { %s822_s15 = smov [#allocation8]   ;;  %s823_s17 = smov 256  }
   0x9   :  { %s63_s16 = sshll.u32 %s822_s15, 4  ;;  %s824_s1 = smov 16   ;;  %s64_s16 = int_to_ptr.vmem [resolvable:$true] %s63_s16 }
   0xa   :  { %69 = dma.hbm_to_vmem [thread:$0]  %s62_s12, 768, %s64_s16, [#allocation9], %s823_s17, %s823_s17, %s824_s1  }
   0xb   :  { %s87_s20 = sshll.u32 %s953_s5, 4  ;;  %s825_s21 = smov [#allocation11]   ;;  %s88_s20 = int_to_ptr.hbm [resolvable:$true] %s87_s20 }
   0xc   :  { %s89_s3 = sshll.u32 %s825_s21, 4  ;;  %s22_s24 = sshll.u32 %s948_s0, 4  ;;  %s90_s3 = int_to_ptr.vmem [resolvable:$true] %s89_s3  ;;  %s23_s24 = int_to_ptr.hbm [resolvable:$true] %s22_s24 }
   0xd   :  { %95 = dma.hbm_to_vmem [thread:$0]  %s88_s20, 2048, %s90_s3, [#allocation12], %s820_s13, %s820_s13, %s821_s14  }
   0xe   :  { %s826_s25 = smov [#allocation2]   ;;  %s48_s29 = sshll.u32 %s950_s2, 4  ;;  %s49_s29 = int_to_ptr.hbm [resolvable:$true] %s48_s29 }
   0xf   :  { %s24_s26 = sshll.u32 %s826_s25, 4  ;;  %s74_s0 = sshll.u32 %s952_s4, 4  ;;  %s25_s26 = int_to_ptr.vmem [resolvable:$true] %s24_s26  ;;  %s75_s0 = int_to_ptr.hbm [resolvable:$true] %s74_s0 }
  0x10   :  { %30 = dma.hbm_to_vmem [thread:$0]  %s23_s24, 256, %s25_s26, [#allocation3], %s820_s13, %s820_s13, %s821_s14  }
  0x11   :  { %s827_s9 = smov [#allocation7]   ;;  %s828_s11 = smov [#allocation10]  }
  0x12   :  { %s50_s10 = sshll.u32 %s827_s9, 4  ;;  %s76_s2 = sshll.u32 %s828_s11, 4  ;;  %s51_s10 = int_to_ptr.vmem [resolvable:$true] %s50_s10  ;;  %s77_s2 = int_to_ptr.vmem [resolvable:$true] %s76_s2 }
  0x13   :  { %56 = dma.hbm_to_vmem [thread:$0]  %s49_s29, 512, %s51_s10, [#allocation6], %s820_s13, %s820_s13, %s821_s14  }
  0x14   :  { %s101_s16 = sshll.u32 %s954_s6, 4  ;;  %s829_s4 = smov [#allocation13]   ;;  %s102_s16 = int_to_ptr.hbm [resolvable:$true] %s101_s16 }
  0x15   :  { %82 = dma.hbm_to_vmem [thread:$0]  %s75_s0, 12288, %s77_s2, [#allocation9], %s820_s13, %s820_s13, %s821_s14  }
  0x16   :  { %s103_s17 = sshll.u32 %s829_s4, 4  ;;  %s104_s17 = int_to_ptr.vmem [resolvable:$true] %s103_s17 }
  0x17   :  { %106 = dma.hbm_to_vmem [thread:$0]  %s102_s16, 128, %s104_s17, [#allocation12]  }
  0x18   :  { %809 = dma.done.wait [#allocation3], 256  }
  0x19   :  { %810 = vsyncadd [#allocation3], 4294967040 }
  0x1a   :  { %811 = dma.done.wait [#allocation6], 768  }
  0x1b   :  { %812 = vsyncadd [#allocation6], 4294966528 }
  0x1c   :  { %813 = dma.done.wait [#allocation9], 13056  }
  0x1d   :  { %814 = vsyncadd [#allocation9], 4294954240 }
  0x1e   :  { %815 = dma.done.wait [#allocation12], 2176  }
  0x1f   :  { %816 = vsyncadd [#allocation12], 4294965120  ;;  %vm154_vm0 = vcmask 1040384   ;;  %v145_v0 = vld [vmem:[#allocation8 + $0x20] sm:$0x1]  ;;  %v143_v1 = vld [vmem:[#allocation8 + $0x10] sm:$0xff] }
  0x20   :  { %584 = vmatpush.msk.msra.mxu2 %vm154_vm0, %v145_v0  ;;  %v141_v2 = vld [vmem:[#allocation8] sm:$0xff]  ;;  %v913_v3 = vld [vmem:[#allocation5] sm:$0xff]  ;;  %vm147_vm1 = vcmask 138240   ;;  %v210_v4 = vld [vmem:[#allocation7 + $0x18] sm:$0x1]  ;;  %vm213_vm2 = vcmask 203776  }
  0x21   :  { %v263_v5 = vld [vmem:[#allocation10 + $0x78] sm:$0xff]  ;;  %v209_v6 = vld [vmem:[#allocation7 + $0x10] sm:$0xff]  ;;  %v262_v7 = vld [vmem:[#allocation10 + $0x70] sm:$0xff]  ;;  %s830_s18 = smov [#allocation14]   ;;  %s568_s3 = sshll.u32 %s956_s8, 4  ;;  %s569_s3 = int_to_ptr.hbm [resolvable:$true] %s568_s3 }
  0x22   :  { %175 = vmatpush.msra.mxu2 %v143_v1  ;;  %266 = vmatpush.msra.mxu3 %v263_v5  ;;  %v261_v8 = vld [vmem:[#allocation10 + $0x68] sm:$0xff]  ;;  %v260_v9 = vld [vmem:[#allocation10 + $0x60] sm:$0xff]  ;;  %v208_v10 = vld [vmem:[#allocation7 + $0x8] sm:$0xff]  ;;  %s566_s19 = sshll.u32 %s830_s18, 4  ;;  %s567_s19 = int_to_ptr.vmem [resolvable:$true] %s566_s19 }
  0x23   :  { %v259_v11 = vld [vmem:[#allocation10 + $0x58] sm:$0xff]  ;;  %v207_v12 = vld [vmem:[#allocation7] sm:$0xff]  ;;  %v918_v13 = vld [vmem:[#allocation5 + $0x8] sm:$0xff] }
  0x24   :  { %176 = vmatpush.msra.mxu2 %v141_v2  ;;  %267 = vmatpush.msra.mxu3 %v262_v7  ;;  %v137_v14 = vld [vmem:[#allocation2] sm:$0xff]  ;;  %v138_v15 = vld [vmem:[#allocation2 + $0x8] sm:$0xff]  ;;  %v257_v17 = vld [vmem:[#allocation10 + $0x48] sm:$0xff] }
  0x25   :  { %585 = vmatmul.msk.f32.vlgmr.msra.gmra.mxu2 %vm147_vm1, %v913_v3  ;;  %v258_v16 = vld [vmem:[#allocation10 + $0x50] sm:$0xff]  ;;  %v256_v18 = vld [vmem:[#allocation10 + $0x40] sm:$0xff]  ;;  %v255_v19 = vld [vmem:[#allocation10 + $0x38] sm:$0xff] }
  0x26   :  { %590 = vmatpush.msk.msrb.mxu2 %vm154_vm0, %v210_v4  ;;  %268 = vmatpush.msra.mxu3 %v261_v8  ;;  %v254_v20 = vld [vmem:[#allocation10 + $0x30] sm:$0xff]  ;;  %v253_v21 = vld [vmem:[#allocation10 + $0x28] sm:$0xff]  ;;  %v252_v22 = vld [vmem:[#allocation10 + $0x20] sm:$0xff] }
  0x27   :  { %v251_v23 = vld [vmem:[#allocation10 + $0x18] sm:$0xff]  ;;  %v250_v24 = vld [vmem:[#allocation10 + $0x10] sm:$0xff]  ;;  %v249_v25 = vld [vmem:[#allocation10 + $0x8] sm:$0xff] }
  0x28   :  { %236 = vmatpush.msrb.mxu2 %v209_v6  ;;  %269 = vmatpush.msra.mxu3 %v260_v9  ;;  %v248_v26 = vld [vmem:[#allocation10] sm:$0xff]  ;;  %v307_v27 = vld [vmem:[#allocation10 + $0xf8] sm:$0xff]  ;;  %v306_v28 = vld [vmem:[#allocation10 + $0xf0] sm:$0xff] }
  0x29   :  { %308 = vmatpush.msra.mxu0 %v307_v27  ;;  %v305_v29 = vld [vmem:[#allocation10 + $0xe8] sm:$0xff]  ;;  %v304_v31 = vld [vmem:[#allocation10 + $0xe0] sm:$0xff]  ;;  %v303_v32 = vld [vmem:[#allocation10 + $0xd8] sm:$0xff] }
  0x2a   :  { %237 = vmatpush.msrb.mxu2 %v208_v10  ;;  %270 = vmatpush.msra.mxu3 %v259_v11  ;;  %v302_v33 = vld [vmem:[#allocation10 + $0xd0] sm:$0xff]  ;;  %v301_v34 = vld [vmem:[#allocation10 + $0xc8] sm:$0xff]  ;;  %v300_v36 = vld [vmem:[#allocation10 + $0xc0] sm:$0xff] }
  0x2b   :  { %309 = vmatpush.msra.mxu0 %v306_v28  ;;  %v299_v37 = vld [vmem:[#allocation10 + $0xb8] sm:$0xff]  ;;  %v605_v38 = vld [vmem:[#allocation13] ss:$0 sm:$0xff]  ;;  %v298_v39 = vld [vmem:[#allocation10 + $0xb0] sm:$0xff] }
  0x2c   :  { %238 = vmatpush.msrb.mxu2 %v207_v12  ;;  %271 = vmatpush.msra.mxu3 %v258_v16  ;;  %v297_v40 = vld [vmem:[#allocation10 + $0xa8] sm:$0xff]  ;;  %v296_v43 = vld [vmem:[#allocation10 + $0xa0] sm:$0xff]  ;;  %v295_v45 = vld [vmem:[#allocation10 + $0x98] sm:$0xff] }
  0x2d   :  { %586 = vmatmul.msk.f32.gmra.mxu2 %vm147_vm1, %v918_v13  ;;  %310 = vmatpush.msra.mxu0 %v305_v29  ;;  %v294_v49 = vld [vmem:[#allocation10 + $0x90] sm:$0xff]  ;;  %v293_v50 = vld [vmem:[#allocation10 + $0x88] sm:$0xff]  ;;  %v292_v51 = vld [vmem:[#allocation10 + $0x80] sm:$0xff] }
  0x2e   :  { %272 = vmatpush.msra.mxu3 %v257_v17  ;;  %v146_v52 = vld [vmem:[#allocation8 + $0x28] sm:$0x1]  ;;  %v144_v53 = vld [vmem:[#allocation8 + $0x18] sm:$0xff]  ;;  %v352_v56 = vld [vmem:[#allocation10 + $0x170] sm:$0xff] }
  0x2f   :  { %311 = vmatpush.msra.mxu0 %v304_v31  ;;  %587 = vmatpush.msk.msra.mxu1 %vm154_vm0, %v146_v52  ;;  %v142_v54 = vld [vmem:[#allocation8 + $0x8] sm:$0xff]  ;;  %v351_v57 = vld [vmem:[#allocation10 + $0x168] sm:$0xff]  ;;  %v350_v58 = vld [vmem:[#allocation10 + $0x160] sm:$0xff] }
  0x30   :  { %273 = vmatpush.msra.mxu3 %v256_v18  ;;  %v353_v55 = vld [vmem:[#allocation10 + $0x178] sm:$0xff]  ;;  %v348_v60 = vld [vmem:[#allocation10 + $0x150] sm:$0xff]  ;;  %v347_v61 = vld [vmem:[#allocation10 + $0x148] sm:$0xff] }
  0x31   :  { %312 = vmatpush.msra.mxu0 %v303_v32  ;;  %198 = vmatpush.msra.mxu1 %v144_v53  ;;  %v349_v59 = vld [vmem:[#allocation10 + $0x158] sm:$0xff]  ;;  %v606_v62 = vld [vmem:[#allocation13 + $0x1] ss:$0 sm:$0xff]  ;;  %v343_v5 = vld [vmem:[#allocation10 + $0x128] sm:$0xff] }
  0x32   :  { %274 = vmatpush.msra.mxu3 %v255_v19  ;;  %v346_v63 = vld [vmem:[#allocation10 + $0x140] sm:$0xff]  ;;  %v345_v1 = vld [vmem:[#allocation10 + $0x138] sm:$0xff]  ;;  %v340_v11 = vld [vmem:[#allocation10 + $0x110] sm:$0xff] }
  0x33   :  { %313 = vmatpush.msra.mxu0 %v302_v33  ;;  %199 = vmatpush.msra.mxu1 %v142_v54  ;;  %v342_v6 = vld [vmem:[#allocation10 + $0x120] sm:$0xff]  ;;  %v341_v10 = vld [vmem:[#allocation10 + $0x118] sm:$0xff]  ;;  %v339_v12 = vld [vmem:[#allocation10 + $0x108] sm:$0xff] }
  0x34   :  { %275 = vmatpush.msra.mxu3 %v254_v20  ;;  %588 = vmatmul.msk.f32.vlgmr.msra.gmra.mxu1 %vm147_vm1, %v913_v3  ;;  %v344_v3 = vld [vmem:[#allocation10 + $0x130] sm:$0xff]  ;;  %v395_v16 = vld [vmem:[#allocation10 + $0x1e8] sm:$0xff]  ;;  %v394_v17 = vld [vmem:[#allocation10 + $0x1e0] sm:$0xff] }
  0x35   :  { %591 = vmatmul.msk.f32.vlgmr.msrb.gmra.mxu2 %vm213_vm2, %v137_v14  ;;  %314 = vmatpush.msra.mxu0 %v301_v34  ;;  %v397_v14 = vld [vmem:[#allocation10 + $0x1f8] sm:$0xff]  ;;  %v392_v19 = vld [vmem:[#allocation10 + $0x1d0] sm:$0xff]  ;;  %v391_v20 = vld [vmem:[#allocation10 + $0x1c8] sm:$0xff] }
  0x36   :  { %276 = vmatpush.msra.mxu3 %v253_v21  ;;  %356 = vmatpush.msrb.mxu1 %v353_v55  ;;  %v393_v18 = vld [vmem:[#allocation10 + $0x1d8] sm:$0xff]  ;;  %v390_v21 = vld [vmem:[#allocation10 + $0x1c0] sm:$0xff]  ;;  %v387_v27 = vld [vmem:[#allocation10 + $0x1a8] sm:$0xff] }
  0x37   :  { %315 = vmatpush.msra.mxu0 %v300_v36  ;;  %400 = vmatpush.msra.mxu2 %v397_v14  ;;  %v386_v29 = vld [vmem:[#allocation10 + $0x1a0] sm:$0xff]  ;;  %v385_v32 = vld [vmem:[#allocation10 + $0x198] sm:$0xff]  ;;  %v431_v52 = vld [vmem:[#allocation10 + $0x228] sm:$0xff] }
  0x38   :  { %277 = vmatpush.msra.mxu3 %v252_v22  ;;  %357 = vmatpush.msrb.mxu1 %v352_v56  ;;  %v389_v22 = vld [vmem:[#allocation10 + $0x1b8] sm:$0xff]  ;;  %v430_v55 = vld [vmem:[#allocation10 + $0x220] sm:$0xff] }
  0x39   :  { %316 = vmatpush.msra.mxu0 %v299_v37  ;;  %v476_v14 = vld [vmem:[#allocation10 + $0x2a0] sm:$0xff] }
  0x3a   :  { %278 = vmatpush.msra.mxu3 %v251_v23  ;;  %358 = vmatpush.msrb.mxu1 %v351_v57  ;;  %v607_v23 = vld [vmem:[#allocation13 + $0x2] ss:$0 sm:$0xff]  ;;  %v429_v57 = vld [vmem:[#allocation10 + $0x218] sm:$0xff] }
  0x3b   :  { %317 = vmatpush.msra.mxu0 %v298_v39  ;;  %v383_v39 = vld [vmem:[#allocation10 + $0x188] sm:$0xff] }
  0x3c   :  { %279 = vmatpush.msra.mxu3 %v250_v24  ;;  %359 = vmatpush.msrb.mxu1 %v350_v58  ;;  %v388_v24 = vld [vmem:[#allocation10 + $0x1b0] sm:$0xff] }
  0x3d   :  { %592 = vmatmul.msk.f32.gmra.mxu2 %vm213_vm2, %v138_v15  ;;  %318 = vmatpush.msra.mxu0 %v297_v40  ;;  %v396_v15 = vld [vmem:[#allocation10 + $0x1f0] sm:$0xff] }
  0x3e   :  { %280 = vmatpush.msra.mxu3 %v249_v25  ;;  %360 = vmatpush.msrb.mxu1 %v349_v59 }
  0x3f   :  { %319 = vmatpush.msra.mxu0 %v296_v43  ;;  %589 = vmatmul.msk.f32.gmra.mxu1 %vm147_vm1, %v918_v13  ;;  %v338_v13 = vld [vmem:[#allocation10 + $0x100] sm:$0xff]  ;;  %v439_v43 = vld [vmem:[#allocation10 + $0x268] sm:$0xff] }
  0x40   :  { %281 = vmatpush.msra.mxu3 %v248_v26  ;;  %361 = vmatpush.msrb.mxu1 %v348_v60 }
  0x41   :  { %320 = vmatpush.msra.mxu0 %v295_v45  ;;  %401 = vmatpush.msra.mxu2 %v396_v15  ;;  %v437_v45 = vld [vmem:[#allocation10 + $0x258] sm:$0xff] }
  0x42   :  { %362 = vmatpush.msrb.mxu1 %v347_v61  ;;  %v428_v61 = vld [vmem:[#allocation10 + $0x210] sm:$0xff] }
  0x43   :  { %321 = vmatpush.msra.mxu0 %v294_v49  ;;  %402 = vmatpush.msra.mxu2 %v395_v16  ;;  %v433_v49 = vld [vmem:[#allocation10 + $0x238] sm:$0xff] }
  0x44   :  { %363 = vmatpush.msrb.mxu1 %v346_v63  ;;  %v426_v63 = vld [vmem:[#allocation10 + $0x200] sm:$0xff] }
  0x45   :  { %322 = vmatpush.msra.mxu0 %v293_v50  ;;  %403 = vmatpush.msra.mxu2 %v394_v17  ;;  %v608_v50 = vld [vmem:[#allocation13 + $0x3] ss:$0 sm:$0xff] }
  0x46   :  { %364 = vmatpush.msrb.mxu1 %v345_v1  ;;  %v486_v1 = vld [vmem:[#allocation10 + $0x2f0] sm:$0xff] }
  0x47   :  { %323 = vmatpush.msra.mxu0 %v292_v51  ;;  %404 = vmatpush.msra.mxu2 %v393_v18  ;;  %v432_v51 = vld [vmem:[#allocation10 + $0x230] sm:$0xff] }
  0x48   :  { %365 = vmatpush.msrb.mxu1 %v344_v3  ;;  %v484_v3 = vld [vmem:[#allocation10 + $0x2e0] sm:$0xff] }
  0x49   :  { %405 = vmatpush.msra.mxu2 %v392_v19  ;;  %v475_v19 = vld [vmem:[#allocation10 + $0x298] sm:$0xff] }
  0x4a   :  { %366 = vmatpush.msrb.mxu1 %v343_v5  ;;  %v482_v5 = vld [vmem:[#allocation10 + $0x2d0] sm:$0xff] }
  0x4b   :  { %406 = vmatpush.msra.mxu2 %v391_v20  ;;  %v474_v20 = vld [vmem:[#allocation10 + $0x290] sm:$0xff] }
  0x4c   :  { %367 = vmatpush.msrb.mxu1 %v342_v6  ;;  %v481_v6 = vld [vmem:[#allocation10 + $0x2c8] sm:$0xff] }
  0x4d   :  { %407 = vmatpush.msra.mxu2 %v390_v21  ;;  %v473_v21 = vld [vmem:[#allocation10 + $0x288] sm:$0xff] }
  0x4e   :  { %368 = vmatpush.msrb.mxu1 %v341_v10  ;;  %v478_v10 = vld [vmem:[#allocation10 + $0x2b0] sm:$0xff] }
  0x4f   :  { %408 = vmatpush.msra.mxu2 %v389_v22  ;;  %v472_v22 = vld [vmem:[#allocation10 + $0x280] sm:$0xff] }
  0x50   :  { %369 = vmatpush.msrb.mxu1 %v340_v11  ;;  %v477_v11 = vld [vmem:[#allocation10 + $0x2a8] sm:$0xff] }
  0x51   :  { %409 = vmatpush.msra.mxu2 %v388_v24  ;;  %v529_v24 = vld [vmem:[#allocation11 + $0x70] sm:$0xff] }
  0x52   :  { %370 = vmatpush.msrb.mxu1 %v339_v12 }
  0x53   :  { %410 = vmatpush.msra.mxu2 %v387_v27  ;;  %v526_v27 = vld [vmem:[#allocation11 + $0x58] sm:$0xff] }
  0x54   :  { %371 = vmatpush.msrb.mxu1 %v338_v13 }
  0x55   :  { %411 = vmatpush.msra.mxu2 %v386_v29  ;;  %v524_v29 = vld [vmem:[#allocation11 + $0x48] sm:$0xff] }
  0x57   :  { %412 = vmatpush.msra.mxu2 %v385_v32  ;;  %v522_v32 = vld [vmem:[#allocation11 + $0x38] sm:$0xff] }
  0xa8   :  { %v922_v30 = vpop.f32.mrf.mxu2 }
  0xb0   :  { %v924_v35 = vpop.f32.mrf.mxu2 }
  0xb1   :  { %v933_v40 = vpop.f32.mrf.mxu1 }
  0xb8   :  { %v240_v41 = vpop.f32.mrf.mxu2 }
  0xb9   :  { %v241_v42 = vadd.f32 %v605_v38, %v240_v41  ;;  %v441_v41 = vld [vmem:[#allocation10 + $0x278] sm:$0xff] }
  0xba   :  { %442 = vmatpush.msrb.mxu3 %v441_v41 }
  0xbb   :  { %v246_v44 = vmax.f32 %v241_v42, 0.0  ;;  %v440_v42 = vld [vmem:[#allocation10 + $0x270] sm:$0xff] }
  0xbc   :  { %443 = vmatpush.msrb.mxu3 %v440_v42  ;;  %v518_v42 = vld [vmem:[#allocation11 + $0x18] sm:$0xff] }
  0xbd   :  { %282 = vmatmul.f32.vlgmr.msra.gmra.mxu3 %v246_v44  ;;  %v438_v44 = vld [vmem:[#allocation10 + $0x260] sm:$0xff] }
  0xbe   :  { %444 = vmatpush.msrb.mxu3 %v439_v43 }
  0xc0   :  { %v243_v46 = vpop.f32.mrf.mxu2  ;;  %445 = vmatpush.msrb.mxu3 %v438_v44 }
  0xc1   :  { %v244_v47 = vadd.f32 %v605_v38, %v243_v46  ;;  %v384_v38 = vld [vmem:[#allocation10 + $0x190] sm:$0xff]  ;;  %v935_v46 = vpop.f32.mrf.mxu1 }
  0xc2   :  { %413 = vmatpush.msra.mxu2 %v384_v38  ;;  %446 = vmatpush.msrb.mxu3 %v437_v45  ;;  %v520_v38 = vld [vmem:[#allocation11 + $0x28] sm:$0xff] }
  0xc3   :  { %v247_v48 = vmax.f32 %v244_v47, 0.0  ;;  %v435_v47 = vld [vmem:[#allocation10 + $0x248] sm:$0xff] }
  0xc4   :  { %414 = vmatpush.msra.mxu2 %v383_v39 }
  0xc5   :  { %285 = vmatmul.f32.gmra.mxu3 %v247_v48  ;;  %v434_v48 = vld [vmem:[#allocation10 + $0x240] sm:$0xff] }
 0x140   :  { %v283_v0 = vpop.f32.mrf.mxu3 }
 0x141   :  { %v284_v2 = vadd.f32 %v606_v62, %v283_v0  ;;  %v487_v0 = vld [vmem:[#allocation10 + $0x2f8] sm:$0xff] }
 0x142   :  { %490 = vmatpush.msrb.mxu0 %v487_v0 }
 0x143   :  { %v289_v4 = vmax.f32 %v284_v2, 0.0  ;;  %v485_v2 = vld [vmem:[#allocation10 + $0x2e8] sm:$0xff] }
 0x144   :  { %491 = vmatpush.msrb.mxu0 %v486_v1 }
 0x145   :  { %324 = vmatmul.f32.vlgmr.msra.gmra.mxu0 %v289_v4  ;;  %v483_v4 = vld [vmem:[#allocation10 + $0x2d8] sm:$0xff] }
 0x146   :  { %492 = vmatpush.msrb.mxu0 %v485_v2 }
 0x148   :  { %v286_v7 = vpop.f32.mrf.mxu3  ;;  %493 = vmatpush.msrb.mxu0 %v484_v3 }
 0x149   :  { %v287_v8 = vadd.f32 %v606_v62, %v286_v7  ;;  %v427_v62 = vld [vmem:[#allocation10 + $0x208] sm:$0xff]  ;;  %v480_v7 = vld [vmem:[#allocation10 + $0x2c0] sm:$0xff] }
 0x14a   :  { %494 = vmatpush.msrb.mxu0 %v483_v4 }
 0x14b   :  { %v290_v9 = vmax.f32 %v287_v8, 0.0  ;;  %v479_v8 = vld [vmem:[#allocation10 + $0x2b8] sm:$0xff] }
 0x14c   :  { %495 = vmatpush.msrb.mxu0 %v482_v5 }
 0x14d   :  { %327 = vmatmul.f32.gmra.mxu0 %v290_v9  ;;  %v609_v9 = vld [vmem:[#allocation13 + $0x4] ss:$0 sm:$0xff] }
 0x14e   :  { %496 = vmatpush.msrb.mxu0 %v481_v6 }
 0x150   :  { %497 = vmatpush.msrb.mxu0 %v480_v7 }
 0x152   :  { %498 = vmatpush.msrb.mxu0 %v479_v8 }
 0x154   :  { %499 = vmatpush.msrb.mxu0 %v478_v10 }
 0x156   :  { %500 = vmatpush.msrb.mxu0 %v477_v11 }
 0x158   :  { %501 = vmatpush.msrb.mxu0 %v476_v14 }
 0x15a   :  { %502 = vmatpush.msrb.mxu0 %v475_v19 }
 0x15c   :  { %503 = vmatpush.msrb.mxu0 %v474_v20 }
 0x15e   :  { %504 = vmatpush.msrb.mxu0 %v473_v21 }
 0x160   :  { %505 = vmatpush.msrb.mxu0 %v472_v22 }
 0x1c2   :  { %v325_v25 = vpop.f32.mrf.mxu0 }
 0x1c3   :  { %v326_v26 = vadd.f32 %v325_v25, %v922_v30  ;;  %v382_v30 = vld [vmem:[#allocation10 + $0x180] sm:$0xff]  ;;  %v528_v25 = vld [vmem:[#allocation11 + $0x68] sm:$0xff] }
 0x1c4   :  { %415 = vmatpush.msra.mxu2 %v382_v30  ;;  %v519_v30 = vld [vmem:[#allocation11 + $0x20] sm:$0xff] }
 0x1c5   :  { %v333_v28 = vadd.f32 %v607_v23, %v326_v26  ;;  %v527_v26 = vld [vmem:[#allocation11 + $0x60] sm:$0xff] }
 0x1c7   :  { %v335_v31 = vmax.f32 %v333_v28, 0.0  ;;  %v525_v28 = vld [vmem:[#allocation11 + $0x50] sm:$0xff] }
 0x1c9   :  { %372 = vmatmul.f32.vlgmr.msrb.gmra.mxu1 %v335_v31  ;;  %v523_v31 = vld [vmem:[#allocation11 + $0x40] sm:$0xff] }
 0x1ca   :  { %v328_v33 = vpop.f32.mrf.mxu0 }
 0x1cb   :  { %v329_v34 = vadd.f32 %v328_v33, %v924_v35  ;;  %v436_v35 = vld [vmem:[#allocation10 + $0x250] sm:$0xff]  ;;  %v610_v33 = vld [vmem:[#allocation13 + $0x5] ss:$0 sm:$0xff] }
 0x1cc   :  { %447 = vmatpush.msrb.mxu3 %v436_v35 }
 0x1cd   :  { %v334_v36 = vadd.f32 %v607_v23, %v329_v34  ;;  %v530_v23 = vld [vmem:[#allocation11 + $0x78] sm:$0xff]  ;;  %v521_v34 = vld [vmem:[#allocation11 + $0x30] sm:$0xff] }
 0x1ce   :  { %448 = vmatpush.msrb.mxu3 %v435_v47  ;;  %535 = vmatpush.msra.mxu1 %v530_v23  ;;  %v517_v47 = vld [vmem:[#allocation11 + $0x10] sm:$0xff] }
 0x1cf   :  { %v336_v37 = vmax.f32 %v334_v36, 0.0 }
 0x1d0   :  { %449 = vmatpush.msrb.mxu3 %v434_v48  ;;  %536 = vmatpush.msra.mxu1 %v529_v24  ;;  %v516_v48 = vld [vmem:[#allocation11 + $0x8] sm:$0xff] }
 0x1d1   :  { %375 = vmatmul.f32.gmra.mxu1 %v336_v37 }
 0x1d2   :  { %450 = vmatpush.msrb.mxu3 %v433_v49  ;;  %537 = vmatpush.msra.mxu1 %v528_v25  ;;  %v611_v49 = vld [vmem:[#allocation13 + $0x6] ss:$0 sm:$0xff] }
 0x1d4   :  { %451 = vmatpush.msrb.mxu3 %v432_v51  ;;  %538 = vmatpush.msra.mxu1 %v527_v26 }
 0x1d6   :  { %452 = vmatpush.msrb.mxu3 %v431_v52  ;;  %539 = vmatpush.msra.mxu1 %v526_v27 }
 0x1d8   :  { %453 = vmatpush.msrb.mxu3 %v430_v55  ;;  %540 = vmatpush.msra.mxu1 %v525_v28 }
 0x1da   :  { %454 = vmatpush.msrb.mxu3 %v429_v57  ;;  %541 = vmatpush.msra.mxu1 %v524_v29 }
 0x1dc   :  { %455 = vmatpush.msrb.mxu3 %v428_v61  ;;  %542 = vmatpush.msra.mxu1 %v523_v31 }
 0x1de   :  { %456 = vmatpush.msrb.mxu3 %v427_v62  ;;  %543 = vmatpush.msra.mxu1 %v522_v32 }
 0x1e0   :  { %457 = vmatpush.msrb.mxu3 %v426_v63  ;;  %544 = vmatpush.msra.mxu1 %v521_v34 }
 0x1e2   :  { %545 = vmatpush.msra.mxu1 %v520_v38 }
 0x1e4   :  { %546 = vmatpush.msra.mxu1 %v519_v30 }
 0x1e6   :  { %547 = vmatpush.msra.mxu1 %v518_v42 }
 0x1e8   :  { %548 = vmatpush.msra.mxu1 %v517_v47 }
 0x1ea   :  { %549 = vmatpush.msra.mxu1 %v516_v48 }
 0x246   :  { %v373_v53 = vpop.f32.mrf.mxu1 }
 0x247   :  { %v374_v54 = vadd.f32 %v608_v50, %v373_v53 }
 0x249   :  { %v379_v56 = vmax.f32 %v374_v54, 0.0 }
 0x24b   :  { %416 = vmatmul.f32.vlgmr.msra.gmra.mxu2 %v379_v56 }
 0x24e   :  { %v376_v58 = vpop.f32.mrf.mxu1 }
 0x24f   :  { %v377_v59 = vadd.f32 %v608_v50, %v376_v58 }
 0x251   :  { %v380_v60 = vmax.f32 %v377_v59, 0.0 }
 0x253   :  { %419 = vmatmul.f32.gmra.mxu2 %v380_v60 }
 0x2ce   :  { %v417_v12 = vpop.f32.mrf.mxu2 }
 0x2cf   :  { %v418_v13 = vadd.f32 %v609_v9, %v417_v12 }
 0x2d1   :  { %v423_v15 = vmax.f32 %v418_v13, 0.0 }
 0x2d3   :  { %458 = vmatmul.f32.vlgmr.msrb.gmra.mxu3 %v423_v15 }
 0x2d6   :  { %v420_v16 = vpop.f32.mrf.mxu2 }
 0x2d7   :  { %v421_v17 = vadd.f32 %v609_v9, %v420_v16 }
 0x2d9   :  { %v424_v18 = vmax.f32 %v421_v17, 0.0 }
 0x2db   :  { %461 = vmatmul.f32.gmra.mxu3 %v424_v18 }
 0x356   :  { %v459_v36 = vpop.f32.mrf.mxu3 }
 0x357   :  { %v460_v37 = vadd.f32 %v459_v36, %v933_v40  ;;  %v515_v40 = vld [vmem:[#allocation11] sm:$0xff] }
 0x358   :  { %550 = vmatpush.msra.mxu1 %v515_v40 }
 0x359   :  { %v467_v39 = vadd.f32 %v610_v33, %v460_v37 }
 0x35b   :  { %v469_v41 = vmax.f32 %v467_v39, 0.0 }
 0x35d   :  { %506 = vmatmul.f32.vlgmr.msrb.gmra.mxu0 %v469_v41 }
 0x35e   :  { %v462_v43 = vpop.f32.mrf.mxu3 }
 0x35f   :  { %v463_v44 = vadd.f32 %v462_v43, %v935_v46  ;;  %v612_v46 = vld [vmem:[%s955_s7] ss:$0 sm:$0xff] }
 0x361   :  { %v468_v45 = vadd.f32 %v610_v33, %v463_v44 }
 0x363   :  { %v470_v35 = vmax.f32 %v468_v45, 0.0 }
 0x365   :  { %509 = vmatmul.f32.gmra.mxu0 %v470_v35 }
 0x3da   :  { %v507_v50 = vpop.f32.mrf.mxu0 }
 0x3db   :  { %v508_v51 = vadd.f32 %v611_v49, %v507_v50 }
 0x3dd   :  { %v513_v52 = vmax.f32 %v508_v51, 0.0 }
 0x3df   :  { %551 = vmatmul.f32.vlgmr.msra.gmra.mxu1 %v513_v52 }
 0x3e2   :  { %v510_v53 = vpop.f32.mrf.mxu0 }
 0x3e3   :  { %v511_v54 = vadd.f32 %v611_v49, %v510_v53 }
 0x3e5   :  { %v514_v55 = vmax.f32 %v511_v54, 0.0 }
 0x3e7   :  { %554 = vmatmul.f32.gmra.mxu1 %v514_v55 }
 0x45c   :  { %v552_v56 = vpop.f32.mrf.mxu1 }
 0x45d   :  { %v553_v57 = vadd.f32 %v612_v46, %v552_v56 }
 0x45f   :  { %613 = vtanh.f32 %v553_v57 }
 0x464   :  { %v555_v58 = vpop.f32.mrf.mxu1 }
 0x465   :  { %v614_v59 = vpop.eup %613  ;;  %v556_v60 = vadd.f32 %v612_v46, %v555_v58 }
 0x466   :  { %560 = vst [vmem:[#allocation14] sm:$0xff] %v614_v59 }
 0x467   :  { %615 = vtanh.f32 %v556_v60 }
 0x46d   :  { %v616_v61 = vpop.eup %615 }
 0x46e   :  { %561 = vst [vmem:[#allocation14 + $0x8] sm:$0xff] %v616_v61 }
 0x46f   :  { %574 = dma.vmem_to_hbm [thread:$0]  %s567_s19, 256, %s569_s3, [#allocation4], %s820_s13, %s820_s13, %s821_s14  }
 0x470   :  { %817 = dma.done.wait [#allocation4], 256  }
 0x471   :  { %818 = vsyncadd [#allocation4], 4294967040 }
 0x472   :  { %579 = vsyncpa [#allocation3], 1 }
 0x473   :  { %580 = vsyncpa [#allocation6], 1 }
 0x474   :  { %581 = vsyncpa [#allocation9], 1 }
 0x475   :  { %582 = vsyncpa [#allocation12], 1 }
 0x476   :  { %583 = vsyncpa [#allocation4], 1 }

</bundles_post_ra>
